<compile_context>
chip_gen: v7x
topology: tpu7x:2x2x1
jax: 0.10.0
libtpu: 0.0.40
codegen_flags: <defaults>
</compile_context>

<pallas_src>
import functools

import jax
import jax.numpy as jnp
from jax.experimental import pallas as pl
from jax.experimental.pallas import tpu as pltpu


def _pick_tile(full, base, cap):
    """Largest multiple of `base` that divides `full` and is <= cap; else the full dim."""
    if full % base != 0 or full <= base:
        return full
    best = base
    t = base
    while t <= min(full, cap):
        if full % t == 0:
            best = t
        t += base
    return best


def _gem_kernel(p_ref, inv_den_ref, x_ref, mask_ref, out_ref, acc_ref, *, eps):
    # p_ref:       SMEM (1,) f32       -- learnable exponent
    # inv_den_ref: SMEM (B,) f32       -- 1 / clip(mask.sum(1), eps), per batch row
    # x_ref:       VMEM (1, TS, TH)    -- one (seq, hidden) tile of one batch row
    # mask_ref:    VMEM (1, TS, 1)     -- matching attention-mask slice
    # out_ref:     VMEM (1, 1, TH)
    # acc_ref:     VMEM (1, TH) f32    -- running numerator over the S (reduction) axis
    b = pl.program_id(0)
    k = pl.program_id(2)

    @pl.when(k == 0)
    def _():
        acc_ref[...] = jnp.zeros_like(acc_ref)

    p = p_ref[0]
    x = x_ref[0].astype(jnp.float32)       # (TS, TH) -- math always in f32 (v5e has no bf16 VPU/EUP)
    m = mask_ref[0].astype(jnp.float32)    # (TS, 1)

    # Mask AFTER the pow: pow input stays strictly positive (no log(0)); masked terms are 0.
    powed = m * jnp.power(jnp.maximum(x, eps), p)
    acc_ref[...] += jnp.sum(powed, axis=0, keepdims=True)   # (1, TH)

    @pl.when(k == pl.num_programs(2) - 1)
    def _():
        inv_p = 1.0 / p                                      # hoisted: only on the output tile
        mean = acc_ref[...] * inv_den_ref[b]                 # scalar denominator, no S x H broadcast
        out_ref[...] = jnp.power(mean, inv_p)[None].astype(out_ref.dtype)


def gem_text(x, attention_mask, p, eps=1e-6, tile_h_cap=512, tile_s_cap=512):
    """Pallas GeM text pooling.  x: (B,S,H) f32/bf16, attention_mask: (B,S), p: (1,) f32."""
    B, S, H = x.shape

    mask_f = attention_mask.astype(jnp.float32)
    # Per-row denominator is identical for every H lane -> precompute its reciprocal once.
    inv_den = 1.0 / jnp.maximum(jnp.sum(mask_f, axis=1), eps)        # (B,) f32
    mask3 = mask_f.reshape(B, S, 1)

    th = _pick_tile(H, 128, tile_h_cap)   # lane-dense hidden tile (or full H if H % 128 != 0)
    ts = _pick_tile(S, 8, tile_s_cap)     # sublane-aligned sequence tile (or full S)
    n_h = H // th
    n_s = S // ts

    out = pl.pallas_call(
        functools.partial(_gem_kernel, eps=eps),
        out_shape=jax.ShapeDtypeStruct((B, 1, H), x.dtype),
        grid=(B, n_h, n_s),
        in_specs=[
            pl.BlockSpec(memory_space=pltpu.MemorySpace.SMEM),       # p  (kept f32)
            pl.BlockSpec(memory_space=pltpu.MemorySpace.SMEM),       # inv_den (B,) f32
            pl.BlockSpec((1, ts, th), lambda b, h, k: (b, k, h)),    # x tile
            pl.BlockSpec((1, ts, 1), lambda b, h, k: (b, k, 0)),     # mask tile
        ],
        out_specs=pl.BlockSpec((1, 1, th), lambda b, h, k: (b, 0, h)),
        scratch_shapes=[pltpu.VMEM((1, th), jnp.float32)],
        compiler_params=pltpu.CompilerParams(
            dimension_semantics=("parallel", "parallel", "arbitrary"),
            vmem_limit_bytes=32 * 1024 * 1024,
        ),
    )(p.astype(jnp.float32), inv_den, x, mask3)
    return out.reshape(B, H)


def gem_text_ref(x, attention_mask, p, eps=1e-6):
    """Pure-JAX reference mirroring the PyTorch forward exactly."""
    pe = p[0]
    xf = x.astype(jnp.float32)
    mask_e = attention_mask.astype(jnp.float32)[..., None] * jnp.ones_like(xf)
    num = jnp.sum(jnp.power(jnp.maximum(xf, eps) * mask_e, pe), axis=1)
    den = jnp.maximum(jnp.sum(mask_e, axis=1), eps)
    return jnp.power(num / den, 1.0 / pe).astype(x.dtype)


# TODO(synk): the HF backbone, Linear+BatchNorm neck, and ArcFace loss branches of Net have no
# clean single-Pallas-kernel equivalent here; only the GeMText pooling forward is implemented.

if __name__ == "__main__":
    key = jax.random.PRNGKey(0)
    kx, km = jax.random.split(key)

    B, S, H = 2, 8, 32
    x = jax.random.normal(kx, (B, S, H), dtype=jnp.float32)
    attention_mask = (jax.random.uniform(km, (B, S)) > 0.3).astype(jnp.float32)

    # Deterministic parameter init, matching nn.Parameter(torch.ones(1) * 3)
    p = jnp.ones((1,), dtype=jnp.float32) * 3.0

    out = gem_text(x, attention_mask, p)
    out = jax.block_until_ready(out)

    ref = gem_text_ref(x, attention_mask, p)
    assert out.shape == (B, H)
    assert jnp.allclose(out, ref, atol=1e-4, rtol=1e-4), "mismatch vs reference"

    print("KERNEL_OK")
</pallas_src>

<mosaic_0001>
module attributes {stable_mosaic.version = 11 : i64} {
  func.func @_gem_kernel(%arg0: i32, %arg1: i32, %arg2: i32, %arg3: memref<1xf32, #tpu.memory_space<smem>>, %arg4: memref<2xf32, #tpu.memory_space<smem>>, %arg5: memref<1x8x32xf32, #tpu.memory_space<vmem>>, %arg6: memref<1x8x1xf32, #tpu.memory_space<vmem>>, %arg7: memref<1x1x32xf32, #tpu.memory_space<vmem>>, %arg8: memref<1x32xf32, #tpu.memory_space<vmem>>) attributes {dimension_semantics = [#tpu.dimension_semantics<parallel>, #tpu.dimension_semantics<parallel>, #tpu.dimension_semantics<arbitrary>], iteration_bounds = array<i64: 2, 1, 1>, scalar_prefetch = 0 : i64, scratch_operands = 1 : i64, tpu.core_type = #tpu.core_type<tc>, window_params = [{transform_indices = @transform_0, window_bounds = array<i64: 1>}, {transform_indices = @transform_1, window_bounds = array<i64: 2>}, {transform_indices = @transform_2, window_bounds = array<i64: 1, 8, 32>}, {transform_indices = @transform_3, window_bounds = array<i64: 1, 8, 1>}, {transform_indices = @transform_4, window_bounds = array<i64: 1, 1, 32>}]} {
    %c0_i32 = arith.constant 0 : i32
    %0 = arith.cmpi eq, %arg2, %c0_i32 : i32
    %1 = arith.extui %0 : i1 to i32
    %c0_i32_0 = arith.constant 0 : i32
    %2 = arith.cmpi ne, %1, %c0_i32_0 : i32
    scf.if %2 {
      %cst_14 = arith.constant 0.000000e+00 : f32
      %22 = vector.broadcast %cst_14 : f32 to vector<1x32xf32>
      %c0_15 = arith.constant 0 : index
      %c0_16 = arith.constant 0 : index
      %23 = vector.load %arg8[%c0_15, %c0_16] : memref<1x32xf32, #tpu.memory_space<vmem>>, vector<1x32xf32>
      tpu.vector_store %arg8[%c0_15, %c0_16], %22 {strides = array<i32>} : memref<1x32xf32, #tpu.memory_space<vmem>>, vector<1x32xf32>,
    } else {
    }
    %c0 = arith.constant 0 : index
    %3 = memref.load %arg3[%c0] : memref<1xf32, #tpu.memory_space<smem>>
    %c0_1 = arith.constant 0 : index
    %c0_2 = arith.constant 0 : index
    %c0_3 = arith.constant 0 : index
    %4 = vector.load %arg5[%c0_1, %c0_2, %c0_3] : memref<1x8x32xf32, #tpu.memory_space<vmem>>, vector<1x8x32xf32>
    %5 = vector.shape_cast %4 : vector<1x8x32xf32> to vector<8x32xf32>
    %c0_4 = arith.constant 0 : index
    %c0_5 = arith.constant 0 : index
    %c0_6 = arith.constant 0 : index
    %6 = vector.load %arg6[%c0_4, %c0_5, %c0_6] : memref<1x8x1xf32, #tpu.memory_space<vmem>>, vector<1x8x1xf32>
    %7 = vector.shape_cast %6 : vector<1x8x1xf32> to vector<8x1xf32>
    %cst = arith.constant 9.99999997E-7 : f32
    %8 = vector.broadcast %cst : f32 to vector<8x32xf32>
    %9 = arith.maximumf %5, %8 : vector<8x32xf32>
    %10 = vector.broadcast %3 : f32 to vector<8x32xf32>
    %11 = math.powf %9, %10 : vector<8x32xf32>
    %12 = vector.broadcast %7 : vector<8x1xf32> to vector<8x32xf32>
    %13 = arith.mulf %12, %11 : vector<8x32xf32>
    %c0_7 = arith.constant 0 : index
    %c0_8 = arith.constant 0 : index
    %14 = vector.load %arg8[%c0_7, %c0_8] : memref<1x32xf32, #tpu.memory_space<vmem>>, vector<1x32xf32>
    %cst_9 = arith.constant dense<0.000000e+00> : vector<32xf32>
    %15 = vector.multi_reduction <add>, %13, %cst_9 [0] : vector<8x32xf32> to vector<32xf32>
    %16 = vector.shape_cast %15 : vector<32xf32> to vector<1x32xf32>
    %17 = arith.addf %14, %16 : vector<1x32xf32>
    %c0_10 = arith.constant 0 : index
    %c0_11 = arith.constant 0 : index
    %18 = vector.load %arg8[%c0_10, %c0_11] : memref<1x32xf32, #tpu.memory_space<vmem>>, vector<1x32xf32>
    tpu.vector_store %arg8[%c0_10, %c0_11], %17 {strides = array<i32>} : memref<1x32xf32, #tpu.memory_space<vmem>>, vector<1x32xf32>,
    %c0_i32_12 = arith.constant 0 : i32
    %19 = arith.cmpi eq, %arg2, %c0_i32_12 : i32
    %20 = arith.extui %19 : i1 to i32
    %c0_i32_13 = arith.constant 0 : i32
    %21 = arith.cmpi ne, %20, %c0_i32_13 : i32
    scf.if %21 {
      %cst_14 = arith.constant 1.000000e+00 : f32
      %22 = arith.divf %cst_14, %3 : f32
      %c0_15 = arith.constant 0 : index
      %c0_16 = arith.constant 0 : index
      %23 = vector.load %arg8[%c0_15, %c0_16] : memref<1x32xf32, #tpu.memory_space<vmem>>, vector<1x32xf32>
      %24 = arith.index_cast %arg0 : i32 to index
      %25 = memref.load %arg4[%24] : memref<2xf32, #tpu.memory_space<smem>>
      %26 = vector.broadcast %25 : f32 to vector<1x32xf32>
      %27 = arith.mulf %23, %26 : vector<1x32xf32>
      %28 = vector.broadcast %22 : f32 to vector<1x32xf32>
      %29 = math.powf %27, %28 : vector<1x32xf32>
      %30 = vector.shape_cast %29 : vector<1x32xf32> to vector<1x1x32xf32>
      %c0_17 = arith.constant 0 : index
      %c0_18 = arith.constant 0 : index
      %c0_19 = arith.constant 0 : index
      %31 = vector.load %arg7[%c0_17, %c0_18, %c0_19] : memref<1x1x32xf32, #tpu.memory_space<vmem>>, vector<1x1x32xf32>
      tpu.vector_store %arg7[%c0_17, %c0_18, %c0_19], %30 {strides = array<i32>} : memref<1x1x32xf32, #tpu.memory_space<vmem>>, vector<1x1x32xf32>,
    } else {
    }
    return
  }
  func.func @transform_0(%arg0: i32, %arg1: i32, %arg2: i32) -> i32 {
    %c0_i32 = arith.constant 0 : i32
    %c0_i32_0 = arith.constant 0 : i32
    return %c0_i32 : i32
  }
  func.func @transform_1(%arg0: i32, %arg1: i32, %arg2: i32) -> i32 {
    %c0_i32 = arith.constant 0 : i32
    %c0_i32_0 = arith.constant 0 : i32
    return %c0_i32 : i32
  }
  func.func @transform_2(%arg0: i32, %arg1: i32, %arg2: i32) -> (i32, i32, i32) {
    %c0_i32 = arith.constant 0 : i32
    return %arg0, %arg2, %arg1 : i32, i32, i32
  }
  func.func @transform_3(%arg0: i32, %arg1: i32, %arg2: i32) -> (i32, i32, i32) {
    %c0_i32 = arith.constant 0 : i32
    %c0_i32_0 = arith.constant 0 : i32
    return %arg0, %arg2, %c0_i32 : i32, i32, i32
  }
  func.func @transform_4(%arg0: i32, %arg1: i32, %arg2: i32) -> (i32, i32, i32) {
    %c0_i32 = arith.constant 0 : i32
    %c0_i32_0 = arith.constant 0 : i32
    return %arg0, %c0_i32, %arg1 : i32, i32, i32
  }
}

</mosaic_0001>

<bundles_post_ra>
// kernel: tpu_custom_call.1
= control target key start
LH: loop header
LB: loop body
LE: loop exit
PB: predicated region body
PF: predicated region fallthrough
CT: control target
= control target key end

     0   :  { %s1019_s0 = inlined_call_operand.<no memory space> [shape: f32[1], index: 0, kind: input, shape index: {}]   ;;  %s1020_s1 = inlined_call_operand.vmem [shape: f32[2], index: 1, kind: input, shape index: {}]   ;;  %s1021_s2 = inlined_call_operand.vmem [shape: f32[2,8,32], index: 2, kind: input, shape index: {}]   ;;  %s1022_s3 = inlined_call_operand.vmem [shape: f32[2,8,1], index: 3, kind: input, shape index: {}]   ;;  %s1023_s4 = inlined_call_operand.hbm [shape: f32[2,1,32], index: 4, kind: output, shape index: {}]  }
   0x1   :  { %9 = sst [smem:[#allocation3]] %s1019_s0 }
   0x2   :  { %10 = vsyncpa [#allocation6], 0 }
   0x3   :  { %11 = vsyncpa [#allocation5], 0 }
   0x4   :  { %13 = vsyncpa [#allocation5 + $0x1], 0  ;;  %s765_s17 = smov 0   ;;  %s767_s18 = smov 0  }
   0x5   :  { %s769_s19 = smov 0   ;;  %s771_s20 = smov 0  }
   0x6   :  { %s773_s21 = smov 0   ;;  %s775_s22 = smov 0  }
   0x7 LB: > { %s435_s0 = sadd.s32 4294967295, %s730_s22   ;;  %s436_s23 = sadd.s32 4294967294, %s730_s22   ;;  %s730_s22 = sphi %s775_s22, %s19_s22   ;;  %s726_s21 = sphi %s773_s21, %s1055_s21   ;;  %s722_s20 = sphi %s771_s20, %s1054_s20   ;;  %s718_s19 = sphi %s769_s19, %s1053_s19   ;;  %s714_s18 = sphi %s767_s18, %s1052_s18   ;;  %s710_s17 = sphi %s765_s17, %s1051_s17  }
   0x8   : > { %s38_s24 = sadd.s32 1, %s726_s21  ;;  %s147_s25 = sadd.s32 1, %s718_s19 }
   0x9   : > { %p40_p0 = scmp.ge.s32.totalorder %s38_s24, 2  ;;  %p157_p1 = scmp.ne.s32.totalorder %s718_s19, %s714_s18 }
   0xa   : > { %p158_p2 = scmp.eq.s32.totalorder %s435_s0, 1  ;;  %p163_p3 = scmp.ne.s32.totalorder %s714_s18, %s710_s17 }
   0xb   : > { %s1057_s24 = smov (%p40_p0, %s38_s24), 0  ;;  %p164_p5 = scmp.eq.s32.totalorder %s436_s23, 1 }
   0xc   : > { %p805_p4 = por %p158_p2, %p157_p1  ;;  %s142_s27 = ssub.s32 %s726_s21, %s1057_s24 }
   0xd   : > { %p437_p6 = scmp.ge.s32.totalorder %s730_s22, 1  ;;  %p145_p7 = scmp.eq.s32.totalorder %s142_s27, 0 }
   0xe   : > { %p812_p8 = por %p164_p5, %p163_p3  ;;  %p171_p9 = scmp.lt.s32.totalorder %s730_s22, 3 }
   0xf   : > { %s818_s29 = scalar_select %p145_p7, %s718_s19, %s147_s25  }
  0x10   : > { %p820_p10 = pnand %p437_p6, %p171_p9  ;;  %p824_p11 = scmp.eq.s32.totalorder %s435_s0, 0 }
  0x11   : > { %s187_s8 = sshll.u32 %s1020_s1, 4  ;;  %s188_s8 = int_to_ptr.vmem [resolvable:$true] %s187_s8 }
  0x12   : > { %p559_p12 = pneg %p820_p10  ;;  %s633_s9 = scalar_lea.vmem %s188_s8, 16 }
  0x13   : > { %p634_p0 = scmp.ne.s32.totalorder %s188_s8, %s633_s9  ;;  %p641_p5 = scmp.lt.s32.totalorder %s188_s8, %s188_s8 }
  0x14   : > { %p560_p13 = pnand %p824_p11, %p559_p12  ;;  %p642_p6 = scmp.lt.s32.totalorder %s633_s9, %s633_s9 }
  0x16   : > { %p635_p1 = pneg %p560_p13  ;;  %p643_p7 = por %p642_p6, %p641_p5 }
  0x18   : > { %p636_p2 = pnand %p635_p1, %p634_p0 }
  0x1a   : > { %p637_p3 = pneg %p636_p2 }
  0x1c   : > { %p644_p9 = pnand %p643_p7, %p637_p3 }
  0x1e   : > { %647 = shalt.err (!%p644_p9)
}
  0x1f   : > { %s732_s10 = smov [#allocation4]   ;;  %223 = sbr.rel (%p820_p10) target bundleno = 253 (0xfd), region = 36 }
  0x20   : > { %562 = dma.vmem_to_smem (!%p560_p13), %s188_s8, 16, %s732_s10, [#allocation6]  }
  0x26   : > { %701 = dma.done.wait (%p824_p11), [#allocation6], 16  }
  0x27   : > { %703 = vsyncadd (%p824_p11), [#allocation6], 4294967280 }
  0x28   : > { %229 = sfence }
  0x29   : > { %s284_s11 = sld [smem:[#allocation3]]  ;;  %p261_p12 = scmp.lt.s32.totalorder %s722_s20, 1  ;;  %v733_v0 = vmov 0   ;;  %v734_v11 = vmov 2139095040   ;;  %v1033_v14 = vmov 0  ;;  %vm282_vm9 = vcmask 253952  }
  0x2a   : > { %622 = vset.pattern.permute.xlu0 %v733_v0  ;;  %v735_v18 = vmov 0.0   ;;  %s315_s27 = sld [smem:[#allocation4 + %s722_s20]]  ;;  %s259_s5 = sand.u32 1, %s714_s18  }
  0x2b   : > { %s262_s12 = scalar_select %p261_p12, %s722_s20, 1  ;;  %283 = vst.msk [vmem:[#allocation2] sm:$0x1] %vm282_vm9, %v735_v18 }
  0x2c   : > { %s444_s6 = sshll.u32 %s722_s20, 4  ;;  %s260_s7 = scalar_lea.vmem [#allocation7], %s259_s5 }
  0x2d   : > { %s442_s13 = sshll.u32 %s262_s12, 3  ;;  %s335_s8 = sshll.u32 %s260_s7, 4  ;;  %s971_s8 = int_to_ptr.vmem [resolvable:$true] %s335_s8 }
  0x2e   : > { %s277_s16 = scalar_lea.vmem %s1022_s3, %s442_s13  ;;  %s270_s25 = scalar_lea.vmem %s1021_s2, %s442_s13 }
  0x2f   : > { %v850_v1 = vstv %s284_s11  ;;  %v286_v2 = vld [vmem:[%s277_s16] sm:$0xff]  ;;  %s969_s11 = scalar_lea.hbm %s1023_s4, %s444_s6  ;;  %s322_s20 = scalar_lea.sflag [#allocation5], %s259_s5 }
  0x30   : > { %v285_v3 = vld [vmem:[%s270_s25] sm:$0xff]  ;;  %292 = vperm.xlu0 %622, %v286_v2   ;;  %623 = vrcp.f32 %v850_v1  ;;  %v451_v5 = vand.u32 2147483647, %v850_v1  ;;  %vm455_vm0 = vcmp.lt.f32.partialorder %v850_v1, 0  ;;  %v456_v6 = vtrunc.f32 %v850_v1  ;;  %s648_s12 = scalar_lea.vmem %s971_s8, 16  ;;  %s736_s13 = smov [#allocation7]  }
  0x31   : > { %v287_v4 = vmax.f32 %v285_v3, 1e-06  ;;  %v487_v12 = vsel %vm455_vm0, 0, %v734_v11  ;;  %v475_v28 = vsel %vm455_vm0, 2139095040, %v733_v0  ;;  %v316_v50 = vstv %s315_s27  ;;  %p649_p10 = scmp.ne.s32.totalorder %s971_s8, %s648_s12  ;;  %s652_s14 = sshll.u32 %s736_s13, 4  ;;  %s653_s14 = int_to_ptr.vmem [resolvable:$false] %s652_s14 }
  0x32   : > { %vm1024_vm1 = vcmp.eq.f32.partialorder %v451_v5, 2139095040  ;;  %v460_v7 = vtrunc.f32 %v451_v5  ;;  %vm457_vm2 = vcmp.ne.f32.partialorder %v850_v1, %v456_v6  ;;  %vm459_vm10 = vcmp.lt.f32.partialorder %v451_v5, 1266679808  ;;  %v296_v47 = vld [vmem:[#allocation2] sm:$0x1]  ;;  %s654_s15 = scalar_lea.vmem %s653_s14, 32  ;;  %p655_p0 = scmp.lt.s32.totalorder %s971_s8, %s653_s14 }
  0x33   : > { %v447_v8 = vand.u32 2147483647, %v287_v4  ;;  %vm858_vm3 = vmor %vm457_vm2, %vm1024_vm1  ;;  %vm1026_vm4 = vcmp.lt.f32.partialorder %v287_v4, 0  ;;  %vm1025_vm5 = vcmp.eq.f32.partialorder %v287_v4, 0  ;;  %v488_v15 = vxor.u32 2147483648, %v487_v12  ;;  %p650_p11 = pnand %p649_p10, %p805_p4  ;;  %p656_p1 = scmp.lt.s32.totalorder %s654_s15, %s648_s12 }
  0x34   : > { %v461_v10 = vcvt.f32.s32 %v460_v7  ;;  %vm464_vm6 = vmneg %vm858_vm3  ;;  %vm470_vm13 = vcmp.lt.s32.totalorder %v287_v4, 0  ;;  %vm492_vm1 = vcmp.ne.f32.partialorder %v287_v4, %v287_v4 }
  0x35   : > { %625 = vlog2.f32 %v447_v8  ;;  %vm471_vm7 = vcmp.gt.f32.partialorder %v447_v8, 1065353216  ;;  %vm870_vm8 = vmand %vm1026_vm4, %vm858_vm3  ;;  %vm493_vm3 = vcmp.ne.f32.partialorder %v850_v1, %v850_v1  ;;  %vm469_vm4 = vcmp.eq.f32.partialorder %v287_v4, 1065353216  ;;  %p651_p13 = pneg %p650_p11  ;;  %p657_p2 = por %p656_p1, %p655_p0 }
  0x36   : > { %v462_v13 = vand.u32 1, %v461_v10  ;;  %v1034_v14 = vsel %vm870_vm8, 4294967295, %v1033_v14  ;;  %vm877_vm11 = vmand %vm455_vm0, %vm1025_vm5  ;;  %vm453_vm5 = vcmp.eq.f32.partialorder %v850_v1, 0 }
  0x37   : > { %vm883_vm14 = vmxor %vm455_vm0, %vm471_vm7  ;;  %vm484_vm7 = vcmp.eq.f32.partialorder %v287_v4, 3212836864  ;;  %vm297_vm0 = vcmask 261120   ;;  %p658_p3 = pnand %p657_p2, %p651_p13 }
  0x38   : > { %vm463_vm12 = vcmp.eq.s32.totalorder %v462_v13, 1 }
  0x39   : > { %vm465_vm15 = vmand %vm463_vm12, %vm464_vm6 }
  0x3a   : > { %v624_v19 = vpop.eup %623  ;;  %vm466_vm2 = vmand %vm459_vm10, %vm465_vm15  ;;  %vm1041_vm10 = vcmp.lt.f32.partialorder %v287_v4, 0 }
  0x3b   : > { %499 = vpush %v624_v19  ;;  %v489_v20 = vsel %vm466_vm2, %v488_v15, %v487_v12  ;;  %vm891_vm8 = vmand %vm470_vm13, %vm466_vm2  ;;  %vm1045_vm13 = vcmp.eq.f32.partialorder %v287_v4, 0 }
  0x3c   : > { %vm482_vm6 = vmor %vm877_vm11, %vm883_vm14  ;;  %v490_v22 = vsel %vm1041_vm10, %v489_v20, %v487_v12  ;;  %vm1044_vm11 = vnez %v1034_v14 }
  0x3d   : > { %v483_v23 = vsel %vm482_vm6, 2139095040, %v733_v0  ;;  %vm901_vm12 = vmor %vm492_vm1, %vm493_vm3  ;;  %vm472_vm1 = vcmp.eq.f32.partialorder %v447_v8, 2139095040 }
  0x3e   : > { %v485_v25 = vsel %vm484_vm7, 1065353216, %v483_v23  ;;  %vm496_vm15 = vmor %vm469_vm4, %vm453_vm5  ;;  %vm1046_vm4 = vcmp.eq.f32.partialorder %v451_v5, 2139095040  ;;  %vm454_vm5 = vcmp.eq.f32.partialorder %v850_v1, 1065353216 }
  0x3f   : > { %v626_v26 = vpop.eup %625 }
  0x40   : > { %v449_v27 = vmul.f32 %v626_v26, %v850_v1 }
  0x42   : > { %627 = vpow2.f32 %v449_v27 }
  0x4c   : > { %v628_v29 = vpop.eup %627 }
  0x4d   : > { %v474_v30 = vsel %vm1044_vm11, 2143289344, %v628_v29 }
  0x4e   : > { %v476_v31 = vsel %vm1045_vm13, %v475_v28, %v474_v30 }
  0x4f   : > { %v478_v32 = vxor.u32 2147483648, %v476_v31 }
  0x51   : > { %v479_v33 = vsel %vm891_vm8, %v478_v32, %v476_v31 }
  0x52   : > { %v486_v34 = vsel %vm1046_vm4, %v485_v25, %v479_v33 }
  0x53   : > { %v491_v35 = vsel %vm472_vm1, %v490_v22, %v486_v34 }
  0x54   : > { %v495_v36 = vsel %vm901_vm12, 2143289344, %v491_v35 }
  0x55   : > { %v497_v37 = vsel %vm496_vm15, 1065353216, %v495_v36 }
  0x56   : > { %v498_v38 = vsel %vm454_vm5, %v287_v4, %v497_v37 }
  0x6c   : > { %s500_s30 = spop %499 }
  0x6d   : > { %v920_v51 = vstv %s500_s30 }
  0x6e   : > { %v505_v54 = vand.u32 2147483647, %v920_v51  ;;  %v510_v57 = vtrunc.f32 %v920_v51  ;;  %vm509_vm6 = vcmp.lt.f32.partialorder %v920_v51, 0 }
  0x6f   : > { %v541_v63 = vsel %vm509_vm6, 0, %v734_v11  ;;  %v529_v5 = vsel %vm509_vm6, 2139095040, %v733_v0 }
  0x70   : > { %v514_v56 = vtrunc.f32 %v505_v54  ;;  %vm511_vm8 = vcmp.ne.f32.partialorder %v920_v51, %v510_v57  ;;  %vm506_vm14 = vcmp.eq.f32.partialorder %v505_v54, 2139095040  ;;  %vm513_vm12 = vcmp.lt.f32.partialorder %v505_v54, 1266679808 }
  0x71   : > { %vm927_vm2 = vmor %vm511_vm8, %vm506_vm14  ;;  %v542_v2 = vxor.u32 2147483648, %v541_v63 }
  0x72   : > { %v515_v58 = vcvt.f32.s32 %v514_v56  ;;  %vm518_vm7 = vmneg %vm927_vm2 }
  0x74   : > { %v516_v60 = vand.u32 1, %v515_v58 }
  0x76   : > { %vm517_vm3 = vcmp.eq.s32.totalorder %v516_v60, 1 }
  0x77   : > { %vm519_vm15 = vmand %vm517_vm3, %vm518_vm7 }
  0x78   : > { %vm939_vm1 = vmand %vm513_vm12, %vm519_vm15  ;;  %vm547_vm12 = vcmp.ne.f32.partialorder %v920_v51, %v920_v51  ;;  %vm507_vm15 = vcmp.eq.f32.partialorder %v920_v51, 0 }
  0x79   : > { %v543_v9 = vsel %vm939_vm1, %v542_v2, %v541_v63 }
  0xaf   : > { %v293_v39 = vpop.permute.xlu0 %292 }
  0xb0   : > { %v295_v40 = vmul.f32 %v498_v38, %v293_v39 }
  0xb2   : > { %v298_v41 = vsel %vm297_vm0, %v295_v40, 0.0 }
  0xb3   : > { %v299_v42 = vrot.slane %v298_v41, 4 }
  0xb5   : > { %v300_v43 = vadd.f32 %v299_v42, %v298_v41 }
  0xb7   : > { %v301_v44 = vrot.slane %v300_v43, 2 }
  0xb9   : > { %v302_v45 = vadd.f32 %v301_v44, %v300_v43 }
  0xbb   : > { %v303_v46 = vrot.slane %v302_v45, 1 }
  0xbd   : > { %v304_v48 = vadd.f32 %v303_v46, %v302_v45 }
  0xbf   : > { %v305_v49 = vadd.f32 %v304_v48, %v296_v47 }
  0xc1   : > { %307 = vst.msk [vmem:[#allocation2] sm:$0x1] %vm282_vm9, %v305_v49 }
  0xc8   : > { %v314_v52 = vld [vmem:[#allocation2] sm:$0x1] }
  0xc9   : > { %v317_v53 = vmul.f32 %v316_v50, %v314_v52 }
  0xcb   : > { %v501_v55 = vand.u32 2147483647, %v317_v53  ;;  %vm522_vm11 = vcmp.eq.f32.partialorder %v317_v53, 0  ;;  %vm521_vm4 = vcmp.lt.f32.partialorder %v317_v53, 0  ;;  %vm524_vm3 = vcmp.lt.s32.totalorder %v317_v53, 0 }
  0xcc   : > { %vm534_vm5 = vmand %vm509_vm6, %vm522_vm11  ;;  %v544_v12 = vsel %vm521_vm4, %v543_v9, %v541_v63 }
  0xcd   : > { %629 = vlog2.f32 %v501_v55  ;;  %vm525_vm10 = vcmp.gt.f32.partialorder %v501_v55, 1065353216  ;;  %vm527_vm8 = vmand %vm521_vm4, %vm927_vm2  ;;  %vm546_vm2 = vcmp.ne.f32.partialorder %v317_v53, %v317_v53 }
  0xce   : > { %vm535_vm13 = vmxor %vm509_vm6, %vm525_vm10  ;;  %vm538_vm10 = vcmp.eq.f32.partialorder %v317_v53, 3212836864  ;;  %vm523_vm6 = vcmp.eq.f32.partialorder %v317_v53, 1065353216 }
  0xcf   : > { %vm536_vm0 = vmor %vm534_vm5, %vm535_vm13  ;;  %vm508_vm5 = vcmp.eq.f32.partialorder %v920_v51, 1065353216 }
  0xd0   : > { %v537_v7 = vsel %vm536_vm0, 2139095040, %v733_v0  ;;  %vm531_vm7 = vmand %vm524_vm3, %vm939_vm1 }
  0xd1   : > { %v539_v11 = vsel %vm538_vm10, 1065353216, %v537_v7  ;;  %vm548_vm13 = vmor %vm546_vm2, %vm547_vm12 }
  0xd2   : > { %vm550_vm1 = vmor %vm523_vm6, %vm507_vm15 }
  0xd7   : > { %v630_v59 = vpop.eup %629 }
  0xd8   : > { %v503_v61 = vmul.f32 %v630_v59, %v920_v51 }
  0xda   : > { %631 = vpow2.f32 %v503_v61 }
  0xe4   : > { %v632_v3 = vpop.eup %631 }
  0xe5   : > { %v528_v4 = vsel %vm527_vm8, 2143289344, %v632_v3 }
  0xe6   : > { %v530_v6 = vsel %vm522_vm11, %v529_v5, %v528_v4  ;;  %vm526_vm11 = vcmp.eq.f32.partialorder %v501_v55, 2139095040 }
  0xe7   : > { %v532_v8 = vxor.u32 2147483648, %v530_v6 }
  0xe9   : > { %v533_v10 = vsel %vm531_vm7, %v532_v8, %v530_v6 }
  0xea   : > { %v540_v0 = vsel %vm506_vm14, %v539_v11, %v533_v10 }
  0xeb   : > { %v545_v13 = vsel %vm526_vm11, %v544_v12, %v540_v0 }
  0xec   : > { %v549_v14 = vsel %vm548_vm13, 2143289344, %v545_v13 }
  0xed   : > { %v551_v15 = vsel %vm550_vm1, 1065353216, %v549_v14 }
  0xee   : > { %v552_v16 = vsel %vm508_vm5, %v317_v53, %v551_v15 }
  0xef   : > { %320 = vst.msk [vmem:[%s260_s7] sm:$0x1] %vm282_vm9, %v552_v16 }
  0xf0   : > { %661 = shalt.err (!%p658_p3)
}
  0xf1   : > { %s662_s16 = scalar_lea.hbm %s969_s11, 16  ;;  %s666_s25 = scalar_lea.hbm %s1023_s4, 32 }
  0xf2   : > { %p663_p5 = scmp.ne.s32.totalorder %s969_s11, %s662_s16  ;;  %p667_p9 = scmp.lt.u32.totalorder %s969_s11, %s1023_s4 }
  0xf3   : > { %p668_p12 = scmp.lt.u32.totalorder %s666_s25, %s662_s16  ;;  %p670_p11 = scmp.lt.u32.totalorder %s662_s16, %s969_s11 }
  0xf4   : > { %p664_p6 = pnand %p663_p5, %p805_p4 }
  0xf5   : > { %p669_p10 = por %p668_p12, %p667_p9 }
  0xf6   : > { %p665_p7 = pneg %p664_p6 }
  0xf7   : > { %p671_p13 = por %p670_p11, %p669_p10 }
  0xf9   : > { %p672_p0 = pnand %p671_p13, %p665_p7 }
  0xfb   : > { %675 = shalt.err (!%p672_p0)
}
  0xfc   : > { %557 = dma.vmem_to_hbm [thread:$0]  (%p805_p4), %s971_s8, 16, %s969_s11, %s322_s20  }
  0xfd PF: > { %p569_p1 = scmp.ge.s32.totalorder %s730_s22, 2  ;;  %s347_s5 = sand.u32 1, %s710_s17  }
  0xfe   : > { %s348_s6 = scalar_lea.sflag [#allocation5], %s347_s5 }
  0xff   : > { %p564_p2 = pnand %p569_p1, %p812_p8 }
 0x101   : > { %705 = dma.done.wait (!%p564_p2), %s348_s6, 16  }
 0x102   : > { %707 = vsyncadd (!%p564_p2), %s348_s6, 4294967280  ;;  %s19_s22 = sadd.s32 1, %s730_s22   ;;  %s1051_s17 = smov %s714_s18 }
 0x103   : > { %p16_p3 = scmp.ge.s32.totalorder %s19_s22, 4   ;;  %s1052_s18 = smov %s718_s19 }
 0x104   : > { %s1053_s19 = smov %s818_s29  ;;  %s1054_s20 = smov %s726_s21 }
 0x105   : > { %s1055_s21 = smov %s1057_s24  ;;  %18 = sbr.rel (!%p16_p3) target bundleno = 7 (0x7), region = 87 }
 0x10c   :  { %352 = vsyncpa [#allocation5], 1 }
 0x10d   :  { %354 = vsyncpa [#allocation5 + $0x1], 1 }
 0x10e   :  { %355 = vsyncpa [#allocation6], 1 }
 0x10f   :  { %357 = vsyncpa [#allocation6 + $0x1], 1 }

</bundles_post_ra>
